<compile_context>
chip_gen: v7x
topology: tpu7x:2x2x1
jax: 0.10.0
libtpu: 0.0.40
codegen_flags: <defaults>
</compile_context>

<pallas_src>
import jax
import jax.numpy as jnp
from jax.experimental import pallas as pl
from jax.experimental.pallas import tpu as pltpu


# ----------------------------------------------------------------------------
# Fused Pallas kernel: merged 2-layer GCN (both graphs) + one-hot gather + MLP
# ----------------------------------------------------------------------------
def _fused_gcn_classifier_kernel(
    idx_ref,                               # (2*n_pairs, 1) int32: [lig rows ; n_lig + rec rows]
    a_ref,                                 # (N, N) bf16 block-diag normalized adjacency
    x_ref,                                 # (N, input_dim) bf16 stacked node features
    w1_ref, b1_ref,                        # (input_dim, hidden) bf16 / (1, hidden) f32
    w2_ref, b2_ref,                        # (hidden, hidden)   bf16 / (1, hidden) f32
    wfc_ref, bfc_ref,                      # (2*hidden, hidden) bf16 / (1, hidden) f32
    wfc2_ref, bfc2_ref,                    # (1, hidden) f32 / (1, 1) f32
    o_ref,                                 # (n_pairs, 1) f32
):
    hidden = w1_ref.shape[1]
    n_pairs = o_ref.shape[0]
    n_nodes = a_ref.shape[0]

    # Load once, reuse for both layers.
    a = a_ref[...]
    b1 = b1_ref[...]
    b2 = b2_ref[...]

    # ---- GCN layer 1 (both graphs at once): relu(Ahat @ (X @ W1) + b1) ----
    xw = jnp.dot(x_ref[...], w1_ref[...], preferred_element_type=jnp.float32)
    h1 = jnp.maximum(
        jnp.dot(a, xw.astype(jnp.bfloat16), preferred_element_type=jnp.float32) + b1,
        0.0)

    # ---- GCN layer 2: relu(Ahat @ (H1 @ W2) + b2) ----
    hw = jnp.dot(h1.astype(jnp.bfloat16), w2_ref[...], preferred_element_type=jnp.float32)
    h2 = jnp.maximum(
        jnp.dot(a, hw.astype(jnp.bfloat16), preferred_element_type=jnp.float32) + b2,
        0.0)
    h2_bf = h2.astype(jnp.bfloat16)

    # ---- Pair gather as a one-hot MXU matmul (no scalar-indexed loop) ----
    iota = jax.lax.broadcasted_iota(jnp.int32, (2 * n_pairs, n_nodes), 1)
    onehot = (iota == idx_ref[...]).astype(jnp.bfloat16)       # (2*n_pairs, N)
    g_all = jnp.dot(onehot, h2_bf, preferred_element_type=jnp.float32)
    g_lig = g_all[0:n_pairs, :].astype(jnp.bfloat16)
    g_rec = g_all[n_pairs:2 * n_pairs, :].astype(jnp.bfloat16)

    # ---- fc over the concatenated features, expressed as a split matmul ----
    wfc = wfc_ref[...]
    h = (jnp.dot(g_lig, wfc[0:hidden, :], preferred_element_type=jnp.float32)
         + jnp.dot(g_rec, wfc[hidden:2 * hidden, :], preferred_element_type=jnp.float32)
         + bfc_ref[...])
    h = jnp.maximum(h, 0.0)

    # ---- fc2 (out_features = 1): VPU multiply + lane reduction, no N=1 MXU ----
    logits = jnp.sum(h * wfc2_ref[...], axis=-1, keepdims=True) + bfc2_ref[...]
    o_ref[...] = jax.nn.sigmoid(logits)
    # TODO(synk): for n_pairs in the thousands, emit lane-dense (1, n_pairs) logits
    # (padded to a multiple of 128) and reshape in the wrapper instead of the
    # masked (n_pairs, 1) column store.


# ----------------------------------------------------------------------------
# Plain-JAX glue
# ----------------------------------------------------------------------------
def normalized_adjacency(edge_index, num_nodes):
    """Dense D^{-1/2} A' D^{-1/2} in f32; duplicate edges summed, diag forced to 1.

    Matches torch_geometric gcn_norm with all-ones edge weights
    (add_remaining_self_loops with fill_value=1)."""
    src, dst = edge_index[0], edge_index[1]
    a = jnp.zeros((num_nodes, num_nodes), jnp.float32).at[dst, src].add(1.0)
    eye = jnp.eye(num_nodes, dtype=jnp.float32)
    a = a * (1.0 - eye) + eye
    deg = a.sum(axis=1)
    dinv = jnp.where(deg > 0, 1.0 / jnp.sqrt(deg), 0.0)
    return dinv[:, None] * a * dinv[None, :]


def gcn_classifier_forward(params, data):
    x_s, x_t = data["x_s"], data["x_t"]
    n_lig, n_rec = x_s.shape[0], x_t.shape[0]
    n_nodes = n_lig + n_rec
    hidden = params["w1"].shape[1]
    y = data["y"].astype(jnp.int32)
    n_pairs = y.shape[0]

    # Block-diagonal normalized adjacency: the graphs are disjoint, so the
    # union's gcn_norm equals the block-diag of each graph's gcn_norm.
    # Normalization is computed in f32, then cast to bf16 for the MXU.
    a_s = normalized_adjacency(data["edge_index_s"], n_lig)
    a_t = normalized_adjacency(data["edge_index_t"], n_rec)
    a_blk = jnp.zeros((n_nodes, n_nodes), jnp.float32)
    a_blk = a_blk.at[:n_lig, :n_lig].set(a_s).at[n_lig:, n_lig:].set(a_t)
    a_blk = a_blk.astype(jnp.bfloat16)

    x_all = jnp.concatenate([x_s, x_t], axis=0).astype(jnp.bfloat16)

    # Combined row indices for the one-hot gather, clamped (no OOB possible).
    lig_idx = jnp.clip(y[:, 0], 0, n_lig - 1)
    rec_idx = jnp.clip(y[:, 1], 0, n_rec - 1) + n_lig
    idx_all = jnp.concatenate([lig_idx, rec_idx], axis=0).astype(jnp.int32)[:, None]

    # Linear(hidden, 1) weight as a row vector for the lane reduction.
    w_fc2_row = params["w_fc2"].reshape(1, hidden).astype(jnp.float32)

    operands = (
        idx_all,
        a_blk,
        x_all,
        params["w1"].astype(jnp.bfloat16), params["b1"],
        params["w2"].astype(jnp.bfloat16), params["b2"],
        params["w_fc"].astype(jnp.bfloat16), params["b_fc"],
        w_fc2_row, params["b_fc2"],
    )

    def full(arr):
        return pl.BlockSpec(arr.shape, lambda i: (0,) * arr.ndim)

    return pl.pallas_call(
        _fused_gcn_classifier_kernel,
        out_shape=jax.ShapeDtypeStruct((n_pairs, 1), jnp.float32),
        grid=(1,),
        in_specs=[full(op) for op in operands],
        out_specs=pl.BlockSpec((n_pairs, 1), lambda i: (0, 0)),
        compiler_params=pltpu.CompilerParams(dimension_semantics=("arbitrary",)),
    )(*operands)
    # TODO(synk): for large graphs, row-tile Ahat with a "parallel" grid axis
    # (double-buffered (tile_m, N) bf16 blocks, XW resident across the axis),
    # halve the tile + set vmem_limit_bytes on v7x (64 MiB VMEM) and let the
    # parallel axis use both of its TensorCores; at these toy shapes a single
    # VMEM-resident block is optimal.


# ----------------------------------------------------------------------------
# Deterministic parameter / input construction
# ----------------------------------------------------------------------------
def init_params(key, input_dim, hidden_dim):
    ks = jax.random.split(key, 6)
    scale = 0.1
    return {
        # GCNConv linear weights stored as (in, out) so we compute X @ W
        "w1": scale * jax.random.normal(ks[0], (input_dim, hidden_dim), jnp.float32),
        "b1": jnp.zeros((1, hidden_dim), jnp.float32),
        "w2": scale * jax.random.normal(ks[1], (hidden_dim, hidden_dim), jnp.float32),
        "b2": jnp.zeros((1, hidden_dim), jnp.float32),
        "w_fc": scale * jax.random.normal(ks[2], (2 * hidden_dim, hidden_dim), jnp.float32),
        "b_fc": scale * jax.random.normal(ks[3], (1, hidden_dim), jnp.float32),
        "w_fc2": scale * jax.random.normal(ks[4], (hidden_dim, 1), jnp.float32),
        "b_fc2": scale * jax.random.normal(ks[5], (1, 1), jnp.float32),
    }


if __name__ == "__main__":
    input_dim, hidden_dim = 8, 32
    n_lig, n_rec = 16, 16
    n_edges_s, n_edges_t = 24, 24
    n_pairs = 8

    key = jax.random.PRNGKey(0)
    k_xs, k_xt, k_es, k_et, k_y, k_p = jax.random.split(key, 6)

    data = {
        "x_s": jax.random.normal(k_xs, (n_lig, input_dim), jnp.float32),
        "x_t": jax.random.normal(k_xt, (n_rec, input_dim), jnp.float32),
        "edge_index_s": jax.random.randint(k_es, (2, n_edges_s), 0, n_lig),
        "edge_index_t": jax.random.randint(k_et, (2, n_edges_t), 0, n_rec),
        "y": jnp.stack(
            [jax.random.randint(jax.random.fold_in(k_y, 0), (n_pairs,), 0, n_lig),
             jax.random.randint(jax.random.fold_in(k_y, 1), (n_pairs,), 0, n_rec)],
            axis=1),
    }
    params = init_params(k_p, input_dim, hidden_dim)

    out = gcn_classifier_forward(params, data)
    jax.block_until_ready(out)
    assert out.shape == (n_pairs, 1)
    assert bool(jnp.all(jnp.isfinite(out)))
    assert bool(jnp.all((out >= 0.0) & (out <= 1.0)))
    print("KERNEL_OK")
</pallas_src>

<mosaic_0001>
module attributes {stable_mosaic.version = 11 : i64} {
  func.func @_fused_gcn_classifier_kernel(%arg0: i32, %arg1: memref<16x1xi32, #tpu.memory_space<vmem>>, %arg2: memref<32x32xbf16, #tpu.memory_space<vmem>>, %arg3: memref<32x8xbf16, #tpu.memory_space<vmem>>, %arg4: memref<8x32xbf16, #tpu.memory_space<vmem>>, %arg5: memref<1x32xf32, #tpu.memory_space<vmem>>, %arg6: memref<32x32xbf16, #tpu.memory_space<vmem>>, %arg7: memref<1x32xf32, #tpu.memory_space<vmem>>, %arg8: memref<64x32xbf16, #tpu.memory_space<vmem>>, %arg9: memref<1x32xf32, #tpu.memory_space<vmem>>, %arg10: memref<1x32xf32, #tpu.memory_space<vmem>>, %arg11: memref<1x1xf32, #tpu.memory_space<vmem>>, %arg12: memref<8x1xf32, #tpu.memory_space<vmem>>) attributes {dimension_semantics = [#tpu.dimension_semantics<arbitrary>], iteration_bounds = array<i64: 1>, scalar_prefetch = 0 : i64, scratch_operands = 0 : i64, tpu.core_type = #tpu.core_type<tc>, window_params = [{pipeline_mode = #tpu.pipeline_mode<synchronous>, transform_indices = @transform_0, window_bounds = array<i64: 16, 1>}, {pipeline_mode = #tpu.pipeline_mode<synchronous>, transform_indices = @transform_1, window_bounds = array<i64: 32, 32>}, {pipeline_mode = #tpu.pipeline_mode<synchronous>, transform_indices = @transform_2, window_bounds = array<i64: 32, 8>}, {pipeline_mode = #tpu.pipeline_mode<synchronous>, transform_indices = @transform_3, window_bounds = array<i64: 8, 32>}, {pipeline_mode = #tpu.pipeline_mode<synchronous>, transform_indices = @transform_4, window_bounds = array<i64: 1, 32>}, {pipeline_mode = #tpu.pipeline_mode<synchronous>, transform_indices = @transform_5, window_bounds = array<i64: 32, 32>}, {pipeline_mode = #tpu.pipeline_mode<synchronous>, transform_indices = @transform_6, window_bounds = array<i64: 1, 32>}, {pipeline_mode = #tpu.pipeline_mode<synchronous>, transform_indices = @transform_7, window_bounds = array<i64: 64, 32>}, {pipeline_mode = #tpu.pipeline_mode<synchronous>, transform_indices = @transform_8, window_bounds = array<i64: 1, 32>}, {pipeline_mode = #tpu.pipeline_mode<synchronous>, transform_indices = @transform_9, window_bounds = array<i64: 1, 32>}, {pipeline_mode = #tpu.pipeline_mode<synchronous>, transform_indices = @transform_10, window_bounds = array<i64: 1, 1>}, {pipeline_mode = #tpu.pipeline_mode<synchronous>, transform_indices = @transform_11, window_bounds = array<i64: 8, 1>}]} {
    %c0 = arith.constant 0 : index
    %c0_0 = arith.constant 0 : index
    %0 = vector.load %arg2[%c0, %c0_0] : memref<32x32xbf16, #tpu.memory_space<vmem>>, vector<32x32xbf16>
    %c0_1 = arith.constant 0 : index
    %c0_2 = arith.constant 0 : index
    %1 = vector.load %arg5[%c0_1, %c0_2] : memref<1x32xf32, #tpu.memory_space<vmem>>, vector<1x32xf32>
    %c0_3 = arith.constant 0 : index
    %c0_4 = arith.constant 0 : index
    %2 = vector.load %arg7[%c0_3, %c0_4] : memref<1x32xf32, #tpu.memory_space<vmem>>, vector<1x32xf32>
    %c0_5 = arith.constant 0 : index
    %c0_6 = arith.constant 0 : index
    %3 = vector.load %arg3[%c0_5, %c0_6] : memref<32x8xbf16, #tpu.memory_space<vmem>>, vector<32x8xbf16>
    %c0_7 = arith.constant 0 : index
    %c0_8 = arith.constant 0 : index
    %4 = vector.load %arg4[%c0_7, %c0_8] : memref<8x32xbf16, #tpu.memory_space<vmem>>, vector<8x32xbf16>
    %cst = arith.constant dense<0.000000e+00> : vector<32x32xf32>
    %5 = tpu.matmul %3, %4, %cst {dimension_numbers = #tpu.dot_dimension_numbers<[1], [0], [0], [1], [0, 0, 1, 1], [], []>} : vector<32x8xbf16>, vector<8x32xbf16>, vector<32x32xf32> -> vector<32x32xf32>
    %6 = arith.truncf %5 : vector<32x32xf32> to vector<32x32xbf16>
    %cst_9 = arith.constant dense<0.000000e+00> : vector<32x32xf32>
    %7 = tpu.matmul %0, %6, %cst_9 {dimension_numbers = #tpu.dot_dimension_numbers<[1], [0], [0], [1], [0, 0, 1, 1], [], []>} : vector<32x32xbf16>, vector<32x32xbf16>, vector<32x32xf32> -> vector<32x32xf32>
    %8 = vector.broadcast %1 : vector<1x32xf32> to vector<32x32xf32>
    %9 = arith.addf %7, %8 : vector<32x32xf32>
    %cst_10 = arith.constant 0.000000e+00 : f32
    %10 = vector.broadcast %cst_10 : f32 to vector<32x32xf32>
    %11 = arith.maximumf %9, %10 : vector<32x32xf32>
    %12 = arith.truncf %11 : vector<32x32xf32> to vector<32x32xbf16>
    %c0_11 = arith.constant 0 : index
    %c0_12 = arith.constant 0 : index
    %13 = vector.load %arg6[%c0_11, %c0_12] : memref<32x32xbf16, #tpu.memory_space<vmem>>, vector<32x32xbf16>
    %cst_13 = arith.constant dense<0.000000e+00> : vector<32x32xf32>
    %14 = tpu.matmul %12, %13, %cst_13 {dimension_numbers = #tpu.dot_dimension_numbers<[1], [0], [0], [1], [0, 0, 1, 1], [], []>} : vector<32x32xbf16>, vector<32x32xbf16>, vector<32x32xf32> -> vector<32x32xf32>
    %15 = arith.truncf %14 : vector<32x32xf32> to vector<32x32xbf16>
    %cst_14 = arith.constant dense<0.000000e+00> : vector<32x32xf32>
    %16 = tpu.matmul %0, %15, %cst_14 {dimension_numbers = #tpu.dot_dimension_numbers<[1], [0], [0], [1], [0, 0, 1, 1], [], []>} : vector<32x32xbf16>, vector<32x32xbf16>, vector<32x32xf32> -> vector<32x32xf32>
    %17 = vector.broadcast %2 : vector<1x32xf32> to vector<32x32xf32>
    %18 = arith.addf %16, %17 : vector<32x32xf32>
    %cst_15 = arith.constant 0.000000e+00 : f32
    %19 = vector.broadcast %cst_15 : f32 to vector<32x32xf32>
    %20 = arith.maximumf %18, %19 : vector<32x32xf32>
    %21 = arith.truncf %20 : vector<32x32xf32> to vector<32x32xbf16>
    %22 = tpu.iota {dimensions = array<i32: 1>} : vector<16x32xi32>
    %c0_16 = arith.constant 0 : index
    %c0_17 = arith.constant 0 : index
    %23 = vector.load %arg1[%c0_16, %c0_17] : memref<16x1xi32, #tpu.memory_space<vmem>>, vector<16x1xi32>
    %24 = vector.broadcast %23 : vector<16x1xi32> to vector<16x32xi32>
    %25 = arith.cmpi eq, %22, %24 : vector<16x32xi32>
    %26 = arith.extui %25 : vector<16x32xi1> to vector<16x32xi32>
    %27 = arith.sitofp %26 : vector<16x32xi32> to vector<16x32xf32>
    %28 = arith.truncf %27 : vector<16x32xf32> to vector<16x32xbf16>
    %cst_18 = arith.constant dense<0.000000e+00> : vector<16x32xf32>
    %29 = tpu.matmul %28, %21, %cst_18 {dimension_numbers = #tpu.dot_dimension_numbers<[1], [0], [0], [1], [0, 0, 1, 1], [], []>} : vector<16x32xbf16>, vector<32x32xbf16>, vector<16x32xf32> -> vector<16x32xf32>
    %30 = vector.extract_strided_slice %29 {offsets = [0, 0], sizes = [8, 32], strides = [1, 1]} : vector<16x32xf32> to vector<8x32xf32>
    %31 = arith.truncf %30 : vector<8x32xf32> to vector<8x32xbf16>
    %32 = vector.extract_strided_slice %29 {offsets = [8, 0], sizes = [8, 32], strides = [1, 1]} : vector<16x32xf32> to vector<8x32xf32>
    %33 = arith.truncf %32 : vector<8x32xf32> to vector<8x32xbf16>
    %c0_19 = arith.constant 0 : index
    %c0_20 = arith.constant 0 : index
    %34 = vector.load %arg8[%c0_19, %c0_20] : memref<64x32xbf16, #tpu.memory_space<vmem>>, vector<64x32xbf16>
    %35 = vector.extract_strided_slice %34 {offsets = [0, 0], sizes = [32, 32], strides = [1, 1]} : vector<64x32xbf16> to vector<32x32xbf16>
    %cst_21 = arith.constant dense<0.000000e+00> : vector<8x32xf32>
    %36 = tpu.matmul %31, %35, %cst_21 {dimension_numbers = #tpu.dot_dimension_numbers<[1], [0], [0], [1], [0, 0, 1, 1], [], []>} : vector<8x32xbf16>, vector<32x32xbf16>, vector<8x32xf32> -> vector<8x32xf32>
    %37 = vector.extract_strided_slice %34 {offsets = [32, 0], sizes = [32, 32], strides = [1, 1]} : vector<64x32xbf16> to vector<32x32xbf16>
    %cst_22 = arith.constant dense<0.000000e+00> : vector<8x32xf32>
    %38 = tpu.matmul %33, %37, %cst_22 {dimension_numbers = #tpu.dot_dimension_numbers<[1], [0], [0], [1], [0, 0, 1, 1], [], []>} : vector<8x32xbf16>, vector<32x32xbf16>, vector<8x32xf32> -> vector<8x32xf32>
    %39 = arith.addf %36, %38 : vector<8x32xf32>
    %c0_23 = arith.constant 0 : index
    %c0_24 = arith.constant 0 : index
    %40 = vector.load %arg9[%c0_23, %c0_24] : memref<1x32xf32, #tpu.memory_space<vmem>>, vector<1x32xf32>
    %41 = vector.broadcast %40 : vector<1x32xf32> to vector<8x32xf32>
    %42 = arith.addf %39, %41 : vector<8x32xf32>
    %cst_25 = arith.constant 0.000000e+00 : f32
    %43 = vector.broadcast %cst_25 : f32 to vector<8x32xf32>
    %44 = arith.maximumf %42, %43 : vector<8x32xf32>
    %c0_26 = arith.constant 0 : index
    %c0_27 = arith.constant 0 : index
    %45 = vector.load %arg10[%c0_26, %c0_27] : memref<1x32xf32, #tpu.memory_space<vmem>>, vector<1x32xf32>
    %46 = vector.broadcast %45 : vector<1x32xf32> to vector<8x32xf32>
    %47 = arith.mulf %44, %46 : vector<8x32xf32>
    %cst_28 = arith.constant dense<0.000000e+00> : vector<8xf32>
    %48 = vector.multi_reduction <add>, %47, %cst_28 [1] : vector<8x32xf32> to vector<8xf32>
    %49 = vector.shape_cast %48 : vector<8xf32> to vector<8x1xf32>
    %c0_29 = arith.constant 0 : index
    %c0_30 = arith.constant 0 : index
    %50 = vector.load %arg11[%c0_29, %c0_30] : memref<1x1xf32, #tpu.memory_space<vmem>>, vector<1x1xf32>
    %51 = vector.broadcast %50 : vector<1x1xf32> to vector<8x1xf32>
    %52 = arith.addf %49, %51 : vector<8x1xf32>
    %53 = arith.negf %52 : vector<8x1xf32>
    %54 = math.exp %53 : vector<8x1xf32>
    %cst_31 = arith.constant 1.000000e+00 : f32
    %55 = vector.broadcast %cst_31 : f32 to vector<8x1xf32>
    %56 = arith.addf %55, %54 : vector<8x1xf32>
    %57 = arith.divf %55, %56 : vector<8x1xf32>
    %c0_32 = arith.constant 0 : index
    %c0_33 = arith.constant 0 : index
    %58 = vector.load %arg12[%c0_32, %c0_33] : memref<8x1xf32, #tpu.memory_space<vmem>>, vector<8x1xf32>
    tpu.vector_store %arg12[%c0_32, %c0_33], %57 {strides = array<i32>} : memref<8x1xf32, #tpu.memory_space<vmem>>, vector<8x1xf32>,
    return
  }
  func.func @transform_0(%arg0: i32) -> (i32, i32) {
    %c0_i32 = arith.constant 0 : i32
    %c0_i32_0 = arith.constant 0 : i32
    %c0_i32_1 = arith.constant 0 : i32
    return %c0_i32, %c0_i32_0 : i32, i32
  }
  func.func @transform_1(%arg0: i32) -> (i32, i32) {
    %c0_i32 = arith.constant 0 : i32
    %c0_i32_0 = arith.constant 0 : i32
    %c0_i32_1 = arith.constant 0 : i32
    return %c0_i32, %c0_i32_0 : i32, i32
  }
  func.func @transform_2(%arg0: i32) -> (i32, i32) {
    %c0_i32 = arith.constant 0 : i32
    %c0_i32_0 = arith.constant 0 : i32
    %c0_i32_1 = arith.constant 0 : i32
    return %c0_i32, %c0_i32_0 : i32, i32
  }
  func.func @transform_3(%arg0: i32) -> (i32, i32) {
    %c0_i32 = arith.constant 0 : i32
    %c0_i32_0 = arith.constant 0 : i32
    %c0_i32_1 = arith.constant 0 : i32
    return %c0_i32, %c0_i32_0 : i32, i32
  }
  func.func @transform_4(%arg0: i32) -> (i32, i32) {
    %c0_i32 = arith.constant 0 : i32
    %c0_i32_0 = arith.constant 0 : i32
    %c0_i32_1 = arith.constant 0 : i32
    return %c0_i32, %c0_i32_0 : i32, i32
  }
  func.func @transform_5(%arg0: i32) -> (i32, i32) {
    %c0_i32 = arith.constant 0 : i32
    %c0_i32_0 = arith.constant 0 : i32
    %c0_i32_1 = arith.constant 0 : i32
    return %c0_i32, %c0_i32_0 : i32, i32
  }
  func.func @transform_6(%arg0: i32) -> (i32, i32) {
    %c0_i32 = arith.constant 0 : i32
    %c0_i32_0 = arith.constant 0 : i32
    %c0_i32_1 = arith.constant 0 : i32
    return %c0_i32, %c0_i32_0 : i32, i32
  }
  func.func @transform_7(%arg0: i32) -> (i32, i32) {
    %c0_i32 = arith.constant 0 : i32
    %c0_i32_0 = arith.constant 0 : i32
    %c0_i32_1 = arith.constant 0 : i32
    return %c0_i32, %c0_i32_0 : i32, i32
  }
  func.func @transform_8(%arg0: i32) -> (i32, i32) {
    %c0_i32 = arith.constant 0 : i32
    %c0_i32_0 = arith.constant 0 : i32
    %c0_i32_1 = arith.constant 0 : i32
    return %c0_i32, %c0_i32_0 : i32, i32
  }
  func.func @transform_9(%arg0: i32) -> (i32, i32) {
    %c0_i32 = arith.constant 0 : i32
    %c0_i32_0 = arith.constant 0 : i32
    %c0_i32_1 = arith.constant 0 : i32
    return %c0_i32, %c0_i32_0 : i32, i32
  }
  func.func @transform_10(%arg0: i32) -> (i32, i32) {
    %c0_i32 = arith.constant 0 : i32
    %c0_i32_0 = arith.constant 0 : i32
    %c0_i32_1 = arith.constant 0 : i32
    return %c0_i32, %c0_i32_0 : i32, i32
  }
  func.func @transform_11(%arg0: i32) -> (i32, i32) {
    %c0_i32 = arith.constant 0 : i32
    %c0_i32_0 = arith.constant 0 : i32
    %c0_i32_1 = arith.constant 0 : i32
    return %c0_i32, %c0_i32_0 : i32, i32
  }
}

</mosaic_0001>

<bundles_post_ra>
// kernel: tpu_custom_call.1
= control target key start
LH: loop header
LB: loop body
LE: loop exit
PB: predicated region body
PF: predicated region fallthrough
CT: control target
= control target key end

     0   :  { %vm69_vm0 = vcmask 1043456   ;;  %vm62_vm1 = vcmask 64512   ;;  %vm140_vm2 = vcmask 261120   ;;  %v683_v29 = vmov 0   ;;  %s816_s3 = inlined_call_operand.vmem [shape: bf16[8,32], index: 3, kind: input, shape index: {}]   ;;  %s817_s2 = inlined_call_operand.vmem [shape: bf16[32,8], index: 2, kind: input, shape index: {}]   ;;  %s818_s1 = inlined_call_operand.vmem [shape: bf16[32,32], index: 1, kind: input, shape index: {}]   ;;  %s819_s5 = inlined_call_operand.vmem [shape: bf16[32,32], index: 5, kind: input, shape index: {}]   ;;  %s820_s4 = inlined_call_operand.vmem [shape: f32[1,32], index: 4, kind: input, shape index: {}]   ;;  %s821_s0 = inlined_call_operand.vmem [shape: s32[16,1], index: 0, kind: input, shape index: {}]   ;;  %s822_s7 = inlined_call_operand.vmem [shape: bf16[64,32], index: 7, kind: input, shape index: {}]   ;;  %s823_s6 = inlined_call_operand.vmem [shape: f32[1,32], index: 6, kind: input, shape index: {}]   ;;  %s824_s10 = inlined_call_operand.<no memory space> [shape: f32[1,1], index: 10, kind: input, shape index: {}]   ;;  %s825_s8 = inlined_call_operand.vmem [shape: f32[1,32], index: 8, kind: input, shape index: {}]   ;;  %s826_s9 = inlined_call_operand.vmem [shape: f32[1,32], index: 9, kind: input, shape index: {}]   ;;  %s827_s11 = inlined_call_operand.vmem [shape: f32[8,1], index: 11, kind: output, shape index: {}]  }
   0x1   :  { %v51_v0 = vld [vmem:[%s816_s3] sm:$0xf]  ;;  %v670_v3 = vld [vmem:[%s817_s2 + $0x8] sm:$0xff]   ;;  %668 = vset.pattern.permute.xlu0 %v683_v29  ;;  %v684_v38 = vmov 0.0   ;;  %vm685_vm3 = vmmov 0   ;;  %v676_v39 = vld [vmem:[%s822_s7 + $0x10] sm:$0xff]   ;;  %v336_v45 = vlaneseq }
   0x2   :  { %664 = vmatprep.subr.msk.bf16.mxu0 %vm69_vm0, %v51_v0  ;;  %v71_v1 = vsel %vm69_vm0, %v51_v0, 0  ;;  %v669_v2 = vld [vmem:[%s817_s2] sm:$0xff]   ;;  %v672_v11 = vld [vmem:[%s818_s1 + $0x8] sm:$0xff]   ;;  %v678_v0 = vld [vmem:[%s822_s7 + $0x18] sm:$0xff]   ;;  %vm551_vm6 = vcmask 7168  }
   0x3   :  { %611 = vmatpush3.bf16.msra.mxu0 %v71_v1  ;;  %612 = vmatprep.mubr.msk.bf16.mxu0 %vm62_vm1, %v669_v2  ;;  %v671_v4 = vld [vmem:[%s818_s1] sm:$0xff]   ;;  %v674_v13 = vld [vmem:[%s819_s5 + $0x8] sm:$0xff]   ;;  %v337_v53 = vand.u32 127, %v336_v45 }
   0x4   :  { %620 = vmatprep.mubr.msk.bf16.mxu1 %vm140_vm2, %v671_v4  ;;  %v673_v12 = vld [vmem:[%s819_s5] sm:$0xff]   ;;  %v339_v31 = vld [vmem:[%s821_s0 + $0x8] sm:$0xff] }
   0x5   :  { %624 = vmatprep.subr.bf16.mxu0 %v673_v12  ;;  %v561_v14 = vld [vmem:[%s820_s4] ss:$0 sm:$0xff]  ;;  %v677_v63 = vld [vmem:[%s822_s7 + $0x8] sm:$0xff]  }
   0x6   :  { %613 = vmatmul.mubr.msk.bf16.vlgmr.msra.gmra.mrb[0].mxu0 %vm62_vm1, %v670_v3  ;;  %v338_v30 = vld [vmem:[%s821_s0] sm:$0xff] }
   0x7   :  { %625 = vmatpush3.bf16.msra.mxu0 %v673_v12  ;;  %341 = vperm.xlu0 %668, %v338_v30   ;;  %v570_v40 = vld [vmem:[%s823_s6] ss:$0 sm:$0xff] }
   0x8   :  { %626 = vmatprep.subr.bf16.mxu0 %v674_v13  ;;  %v675_v61 = vld [vmem:[%s822_s7] sm:$0xff]  }
   0xb   :  { %627 = vmatpush3.bf16.msra.mxu0 %v674_v13  ;;  %344 = vperm.xlu0 %668, %v339_v31  }
   0xc   :  { %640 = vmatprep.subr.bf16.mxu0 %v684_v38 }
  0x86   :  { %v342_v42 = vpop.permute.xlu0 %341 }
  0x87   :  { %vm346_vm4 = vcmp.eq.s32.totalorder %v337_v53, %v342_v42 }
  0x88   :  { %v573_v59 = vsel %vm346_vm4, 1.0, %v684_v38 }
  0x8a   :  { %v345_v56 = vpop.permute.xlu0 %344 }
  0x8b   :  { %vm347_vm5 = vcmp.eq.s32.totalorder %v337_v53, %v345_v56 }
  0x8c   :  { %v574_v60 = vsel %vm347_vm5, 1.0, %v684_v38 }
  0x8d   :  { %v352_v62 = vpack.c.bf16 %v574_v60, %v573_v59 }
  0xd9   :  { %v614_v5 = vpop.f32.mrb[0].mxu0 }
  0xda   :  { %v107_v6 = vpop.f32.mrb[1].mxu0 }
  0xdb   :  { %v615_v7 = vpop.f32.mrb[2].mxu0 }
  0xdc   :  { %v123_v8 = vpack.c.bf16 %v615_v7, %v614_v5  ;;  %v110_v9 = vpop.f32.mrb[3].mxu0  ;;  %v16_v7 = vstv %s824_s10 }
  0xdd   :  { %v122_v10 = vpack.c.bf16 %v110_v9, %v107_v6  ;;  %17 = vst [vmem:[#allocation2] sm:$0x1] %v16_v7 }
  0xdf   :  { %616 = vmatprep.subr.bf16.mxu1 %v122_v10 }
  0xe0   :  { %617 = vmatpush3.bf16.msra.mxu1 %v122_v10 }
  0xe1   :  { %618 = vmatprep.subr.bf16.mxu1 %v123_v8 }
  0xe4   :  { %619 = vmatpush3.bf16.msra.mxu1 %v123_v8 }
  0xe7   :  { %621 = vmatmul.mubr.msk.bf16.vlgmr.msra.gmra.mrb[0].mxu1 %vm140_vm2, %v672_v11 }
  0xe8   :  { %636 = vmatprep.mubr.msk.bf16.mxu1 %vm140_vm2, %v671_v4 }
 0x1ba   :  { %v622_v15 = vpop.f32.mrb[0].mxu1 }
 0x1bb   :  { %v190_v16 = vadd.f32 %v622_v15, %v561_v14  ;;  %v181_v17 = vpop.f32.mrb[1].mxu1 }
 0x1bc   :  { %v182_v18 = vadd.f32 %v561_v14, %v181_v17  ;;  %v623_v19 = vpop.f32.mrb[2].mxu1 }
 0x1bd   :  { %v193_v20 = vadd.f32 %v623_v19, %v561_v14  ;;  %v184_v21 = vpop.f32.mrb[3].mxu1  ;;  %v198_v23 = vmax.f32 %v190_v16, 0.0  ;;  %v583_v19 = vld [vmem:[%s826_s9] ss:$0 sm:$0xff] }
 0x1be   :  { %v185_v22 = vadd.f32 %v561_v14, %v184_v21  ;;  %v196_v25 = vmax.f32 %v182_v18, 0.0 }
 0x1bf   :  { %v199_v24 = vmax.f32 %v193_v20, 0.0 }
 0x1c0   :  { %v197_v26 = vmax.f32 %v185_v22, 0.0 }
 0x1c1   :  { %v201_v27 = vpack.c.bf16 %v199_v24, %v198_v23  ;;  %v584_v23 = vld [vmem:[#allocation2] ss:$0 sm:$0xff] }
 0x1c2   :  { %v200_v28 = vpack.c.bf16 %v197_v26, %v196_v25 }
 0x1c4   :  { %628 = vmatprep.mubr.msk.bf16.mxu0 %vm140_vm2, %v200_v28 }
 0x1c5   :  { %629 = vmatmul.mubr.msk.bf16.vlgmr.msra.gmra.mrb[4].mxu0 %vm140_vm2, %v201_v27 }
 0x1c6   :  { %644 = vmatprep.mubr.msk.bf16.mxu0 %vm685_vm3, %v684_v38 }
 0x298   :  { %v630_v32 = vpop.f32.mrb[4].mxu0 }
 0x299   :  { %v258_v33 = vpop.f32.mrb[5].mxu0 }
 0x29a   :  { %v631_v34 = vpop.f32.mrb[6].mxu0 }
 0x29b   :  { %v274_v35 = vpack.c.bf16 %v631_v34, %v630_v32  ;;  %v261_v36 = vpop.f32.mrb[7].mxu0 }
 0x29c   :  { %v273_v37 = vpack.c.bf16 %v261_v36, %v258_v33 }
 0x29e   :  { %632 = vmatprep.subr.bf16.mxu1 %v273_v37 }
 0x29f   :  { %633 = vmatpush3.bf16.msra.mxu1 %v273_v37 }
 0x2a0   :  { %634 = vmatprep.subr.bf16.mxu1 %v274_v35 }
 0x2a3   :  { %635 = vmatpush3.bf16.msra.mxu1 %v274_v35 }
 0x2a4   :  { %648 = vmatprep.subr.bf16.mxu1 %v684_v38 }
 0x2a6   :  { %637 = vmatmul.mubr.msk.bf16.vlgmr.msra.gmra.mrb[4].mxu1 %vm140_vm2, %v672_v11  ;;  %v582_v11 = vld [vmem:[%s825_s8] ss:$0 sm:$0xff] }
 0x2a7   :  { %652 = vmatprep.mubr.msk.bf16.mxu1 %vm685_vm3, %v684_v38  ;;  %649 = vmatpush3.bf16.msra.mxu1 %v676_v39 }
 0x2a8   :  { %650 = vmatprep.subr.bf16.mxu1 %v684_v38 }
 0x2ab   :  { %651 = vmatpush3.bf16.msra.mxu1 %v678_v0 }
 0x379   :  { %v638_v41 = vpop.f32.mrb[4].mxu1 }
 0x37a   :  { %v324_v43 = vadd.f32 %v638_v41, %v570_v40  ;;  %v315_v44 = vpop.f32.mrb[5].mxu1 }
 0x37b   :  { %v316_v46 = vadd.f32 %v570_v40, %v315_v44  ;;  %v639_v47 = vpop.f32.mrb[6].mxu1 }
 0x37c   :  { %v327_v48 = vadd.f32 %v639_v47, %v570_v40  ;;  %v318_v49 = vpop.f32.mrb[7].mxu1  ;;  %v332_v51 = vmax.f32 %v324_v43, 0.0 }
 0x37d   :  { %v319_v50 = vadd.f32 %v570_v40, %v318_v49  ;;  %v330_v54 = vmax.f32 %v316_v46, 0.0 }
 0x37e   :  { %v333_v52 = vmax.f32 %v327_v48, 0.0 }
 0x37f   :  { %v331_v55 = vmax.f32 %v319_v50, 0.0 }
 0x380   :  { %v335_v57 = vpack.c.bf16 %v333_v52, %v332_v51 }
 0x381   :  { %v334_v58 = vpack.c.bf16 %v331_v55, %v330_v54 }
 0x383   :  { %641 = vmatpush3.bf16.msra.mxu0 %v334_v58 }
 0x384   :  { %642 = vmatprep.subr.bf16.mxu0 %v684_v38 }
 0x387   :  { %643 = vmatpush3.bf16.msra.mxu0 %v335_v57 }
 0x388   :  { %656 = vmatprep.subr.bf16.mxu0 %v684_v38 }
 0x38a   :  { %645 = vmatmul.mubr.msk.bf16.vlgmr.msra.gmra.mrb[8].mxu0 %vm140_vm2, %v352_v62 }
 0x38b   :  { %657 = vmatpush3.bf16.msra.mxu0 %v675_v61  ;;  %660 = vmatprep.mubr.msk.bf16.mxu0 %vm685_vm3, %v684_v38 }
 0x38c   :  { %658 = vmatprep.subr.bf16.mxu0 %v684_v38 }
 0x38f   :  { %659 = vmatpush3.bf16.msra.mxu0 %v677_v63 }
 0x45d   :  { %v390_v1 = vpop.f32.mrb[8].mxu0 }
 0x45e   :  { %v397_v2 = vpack.c.bf16 %v390_v1, %v390_v1  ;;  %v646_v3 = vpop.f32.mrb[9].mxu0 }
 0x45f   :  { %v393_v4 = vpop.f32.mrb[10].mxu0 }
 0x460   :  { %v398_v5 = vpack.c.bf16 %v393_v4, %v393_v4  ;;  %v647_v6 = vpop.f32.mrb[11].mxu0  ;;  %661 = vmatmul.mubr.msk.bf16.vlgmr.msra.gmra.mrb[12].mxu0 %vm140_vm2, %v397_v2 }
 0x462   :  { %653 = vmatmul.mubr.msk.bf16.vlgmr.msra.gmra.mrb[8].mxu1 %vm140_vm2, %v398_v5 }
 0x533   :  { %v511_v8 = vpop.f32.mrb[12].mxu0 }
 0x534   :  { %v662_v9 = vpop.f32.mrb[13].mxu0 }
 0x535   :  { %v456_v10 = vpop.f32.mrb[8].mxu1  ;;  %v514_v12 = vpop.f32.mrb[14].mxu0 }
 0x536   :  { %v512_v13 = vadd.f32 %v511_v8, %v456_v10  ;;  %v654_v14 = vpop.f32.mrb[9].mxu1  ;;  %v663_v15 = vpop.f32.mrb[15].mxu0 }
 0x537   :  { %v459_v16 = vpop.f32.mrb[10].mxu1 }
 0x538   :  { %v524_v17 = vadd.f32 %v582_v11, %v512_v13  ;;  %v655_v18 = vpop.f32.mrb[11].mxu1 }
 0x53a   :  { %v525_v20 = vmax.f32 %v524_v17, 0.0 }
 0x53c   :  { %v533_v21 = vmul.f32 %v583_v19, %v525_v20 }
 0x53e   :  { %v534_v22 = vsel %vm140_vm2, %v533_v21, 0.0 }
 0x53f   :  { %535 = vadd.xlane.f32.xlu1 %v534_v22 }
 0x5cc   :  { %v536_v24 = vpop.xlane.xlu1 %535 }
 0x5cd   :  { %v544_v25 = vadd.f32 %v584_v23, %v536_v24 }
 0x5cf   :  { %v585_v26 = vmul.f32 -1.442695, %v544_v25 }
 0x5d1   :  { %679 = vpow2.f32 %v585_v26 }
 0x5db   :  { %v680_v27 = vpop.eup %679 }
 0x5dc   :  { %v548_v28 = vadd.f32 1.0, %v680_v27 }
 0x5de   :  { %681 = vrcp.f32 %v548_v28 }
 0x5e8   :  { %v682_v29 = vpop.eup %681 }
 0x5e9   :  { %552 = vst.msk [vmem:[%s827_s11] sm:$0xff] %vm551_vm6, %v682_v29 }

</bundles_post_ra>
